<compile_context>
chip_gen: v5e
topology: v5e:2x2
jax: 0.10.0
libtpu: 0.0.40
codegen_flags: <defaults>
</compile_context>

<pallas_src>
import jax
import jax.numpy as jnp
from jax import lax
from jax.experimental import pallas as pl
from jax.experimental.pallas import tpu as pltpu


def _self_attention_kernel(gamma_ref,   # SMEM (1, 1) f32
                           ones_ref,    # VMEM (1, N) bf16      ones row (denominator operand)
                           x_ref,       # VMEM (1, C, TQ) f32   residual slice
                           xa_ref,      # VMEM (1, C+1, TQ) bf16  [x ; 1] query-side operand
                           kk_ref,      # VMEM (1, C+1, N) bf16   [Wq^T Wk x ; bq^T Wk x]
                           vv_ref,      # VMEM (1, C, N) bf16     Wv x + bv
                           o_ref):      # VMEM (1, C, TQ) f32
    # energy'[i, j] = x_i^T (Wq^T Wk) x_j + (bq^T Wk) x_j  — bias folded into the
    # contraction via the appended ones/bias rows; transposed contraction, no .T.
    energy = lax.dot_general(xa_ref[0], kk_ref[0],
                             (((0,), (0,)), ((), ())),
                             preferred_element_type=jnp.float32)        # (TQ, N) f32

    # Numerically-stabilized, un-normalized softmax numerator, rounded once to bf16 for
    # the MXU.  The denominator below uses the SAME bf16 p -> consistent normalization.
    p_bf = jnp.exp(energy - jnp.max(energy, axis=-1, keepdims=True)
                   ).astype(jnp.bfloat16)                               # (TQ, N) bf16

    # out_un[c, i] = sum_j V[c, j] * p[i, j]  and the per-row denominator, both on MXU.
    out_un = lax.dot_general(vv_ref[0], p_bf,
                             (((1,), (1,)), ((), ())),
                             preferred_element_type=jnp.float32)        # (C, TQ)
    denom = lax.dot_general(ones_ref[...], p_bf,
                            (((1,), (1,)), ((), ())),
                            preferred_element_type=jnp.float32)         # (1, TQ)

    # gamma folded into the approximate reciprocal (EUP slot) -> single FMA epilogue.
    g_inv = gamma_ref[0, 0] * pl.reciprocal(denom, approx=True)         # (1, TQ)
    o_ref[0] = out_un * g_inv + x_ref[0]


def _vmem_budget_bytes():
    """Generation-aware usable-VMEM budget (leave headroom; v7x has only 64 MiB/TC)."""
    cap = 64 * 1024 * 1024
    try:
        info = pltpu.get_tpu_info()
        cap = int(getattr(info, "vmem_capacity_bytes", cap) or cap)
    except Exception:
        pass
    frac = 0.80 if cap <= 64 * 1024 * 1024 else 0.85
    return int(frac * cap)


def _step_vmem_bytes(n_pad, c, tq):
    """Per-grid-step VMEM estimate: double-buffered blocks + in-kernel temps."""
    return (2 * c * tq * 4              # x residual slice, f32 (2 bufs)
            + 2 * (c + 1) * tq * 2      # augmented query operand, bf16 (2 bufs)
            + 2 * (c + 1) * n_pad * 2   # folded key side (+ bias row), bf16 (2 bufs)
            + 2 * c * n_pad * 2         # value projection, bf16 (2 bufs)
            + 2 * n_pad * 2             # ones row, bf16
            + 2 * c * tq * 4            # output tile, f32 (2 bufs)
            + tq * n_pad * 4            # energy tile, f32
            + tq * n_pad * 2            # softmax numerator, bf16
            + (2 << 20))                # layout / compiler slack


def _pick_tq(n_pad, c, budget):
    """Largest lane-dense query tile (multiple of 128 dividing n_pad) fitting the budget."""
    cands = [n_pad] + sorted({t for t in (2048, 1024, 512, 384, 256, 128)
                              if t < n_pad and n_pad % t == 0}, reverse=True)
    for tq in cands:
        est = _step_vmem_bytes(n_pad, c, tq)
        if est <= budget:
            return tq, est
    # TODO(synk): flash-style KV tiling needed when even the smallest tile overflows VMEM.
    tq = cands[-1]
    return tq, _step_vmem_bytes(n_pad, c, tq)


def self_attention(x, wq, bq, wk, bk, wv, bv, gamma):
    """x: (B, C, W, H) float32, NCHW (PyTorch convention). Matches SelfAttention.forward."""
    # bk only contributes per-query-row-constant energy terms (x^T Wq^T bk + bq^T bk),
    # which cancel under the row-wise softmax -> dropping it is exact.
    del bk
    B, C, W, H = x.shape
    N = W * H
    n_pad = ((N + 127) // 128) * 128

    x_flat = x.reshape(B, C, N).astype(jnp.float32)
    if n_pad != N:
        x_flat = jnp.pad(x_flat, ((0, 0), (0, 0), (0, n_pad - N)))

    # ---- fold Q/K and project once in f32 (single bf16 rounding per operand) ----------
    wq32 = wq.astype(jnp.float32)
    wk32 = wk.astype(jnp.float32)
    m_fold = wq32.T @ wk32                                            # (C, C)  Wq^T Wk
    r_fold = bq.astype(jnp.float32) @ wk32                            # (C,)    bq^T Wk

    kk = jnp.einsum('oc,bcn->bon', m_fold, x_flat)                    # (B, C, n_pad)
    bias_row = jnp.einsum('c,bcn->bn', r_fold, x_flat)[:, None, :]    # (B, 1, n_pad)
    if n_pad != N:
        # Mask padded key columns: huge negative bias row -> exp() underflows to 0.
        pad_col = (jnp.arange(n_pad) >= N)[None, None, :]
        bias_row = jnp.where(pad_col, jnp.float32(-1e30), bias_row)
    kk_aug = jnp.concatenate([kk, bias_row], axis=1).astype(jnp.bfloat16)   # (B, C+1, n_pad)

    xa = jnp.concatenate([x_flat, jnp.ones((B, 1, n_pad), jnp.float32)],
                         axis=1).astype(jnp.bfloat16)                 # (B, C+1, n_pad)

    vv = (jnp.einsum('oc,bcn->bon', wv.astype(jnp.float32), x_flat)
          + bv.astype(jnp.float32)[None, :, None]).astype(jnp.bfloat16)     # (B, C, n_pad)

    ones_row = jnp.ones((1, n_pad), jnp.bfloat16)
    gamma2d = jnp.asarray(gamma, jnp.float32).reshape(1, 1)

    # ---- tiling / VMEM budget ----------------------------------------------------------
    budget = _vmem_budget_bytes()
    tq, est = _pick_tq(n_pad, C, budget)
    nq = n_pad // tq
    vmem_limit = int(min(budget, max(int(1.25 * est), 32 * 1024 * 1024)))

    c1 = C + 1
    cost = pl.CostEstimate(
        flops=int(B * n_pad * n_pad * (2 * c1 + 2 * C + 2 + 4) + B * C * n_pad * 3),
        transcendentals=int(B * n_pad * n_pad),
        bytes_accessed=int(B * n_pad * (C * 4          # x (read)
                                        + c1 * 2       # xa (read)
                                        + c1 * 2       # folded K (read)
                                        + C * 2        # V (read)
                                        + C * 4)       # output (write)
                           + n_pad * 2 + 4),
    )

    out_flat = pl.pallas_call(
        _self_attention_kernel,
        out_shape=jax.ShapeDtypeStruct((B, C, n_pad), jnp.float32),
        grid=(B, nq),
        in_specs=[
            pl.BlockSpec(memory_space=pltpu.MemorySpace.SMEM),            # gamma scalar
            pl.BlockSpec((1, n_pad), lambda b, q: (0, 0)),                # ones row
            pl.BlockSpec((1, C, tq), lambda b, q: (b, 0, q)),             # x residual tile
            pl.BlockSpec((1, c1, tq), lambda b, q: (b, 0, q)),            # [x;1] query tile
            pl.BlockSpec((1, c1, n_pad), lambda b, q: (b, 0, 0)),         # folded K (+bias)
            pl.BlockSpec((1, C, n_pad), lambda b, q: (b, 0, 0)),          # value projection
        ],
        out_specs=pl.BlockSpec((1, C, tq), lambda b, q: (b, 0, q)),
        compiler_params=pltpu.CompilerParams(
            dimension_semantics=("parallel", "parallel"),
            vmem_limit_bytes=vmem_limit),
        cost_estimate=cost,
    )(gamma2d, ones_row, x_flat, xa, kk_aug, vv)

    return out_flat[:, :, :N].reshape(B, C, W, H)


def _reference(x, wq, bq, wk, bk, wv, bv, gamma):
    """Plain-JAX replica of the PyTorch forward for validation (full f32)."""
    B, C, W, H = x.shape
    N = W * H
    xf = x.reshape(B, C, N)
    q = jnp.einsum('oc,bcn->bon', wq, xf) + bq[None, :, None]   # (B, C//8, N)
    k = jnp.einsum('oc,bcn->bon', wk, xf) + bk[None, :, None]   # (B, C//8, N)
    v = jnp.einsum('oc,bcn->bon', wv, xf) + bv[None, :, None]   # (B, C,    N)
    energy = jnp.einsum('bci,bcj->bij', q, k)                   # (B, N, N)
    attn = jax.nn.softmax(energy, axis=-1)
    out = jnp.einsum('bcn,bmn->bcm', v, attn)                   # (B, C, N)
    return (gamma * out + xf).reshape(B, C, W, H)


if __name__ == "__main__":
    key = jax.random.PRNGKey(0)
    B, C, W, H = 2, 16, 16, 16        # in_dim = 16 -> C//8 = 2 ; N = 256 (single 256-wide tile)
    C8 = C // 8

    ks = jax.random.split(key, 8)
    x = jax.random.normal(ks[0], (B, C, W, H), jnp.float32)
    wq = jax.random.normal(ks[1], (C8, C), jnp.float32) * 0.1   # Conv2d(C, C//8, 1) weight
    bq = jax.random.normal(ks[2], (C8,), jnp.float32) * 0.1
    wk = jax.random.normal(ks[3], (C8, C), jnp.float32) * 0.1   # Conv2d(C, C//8, 1) weight
    bk = jax.random.normal(ks[4], (C8,), jnp.float32) * 0.1
    wv = jax.random.normal(ks[5], (C, C), jnp.float32) * 0.1    # Conv2d(C, C, 1) weight
    bv = jax.random.normal(ks[6], (C,), jnp.float32) * 0.1
    # PyTorch inits gamma to 0 (output == x); use a nonzero value so the attention path
    # is actually exercised.
    gamma = jnp.float32(0.5)

    out = jax.block_until_ready(self_attention(x, wq, bq, wk, bk, wv, bv, gamma))
    ref = _reference(x, wq, bq, wk, bk, wv, bv, gamma)

    assert out.shape == (B, C, W, H)
    # bf16 MXU operands + approximate reciprocal -> loosened tolerance vs f32 reference.
    max_err = float(jnp.max(jnp.abs(out - ref)))
    assert jnp.allclose(out, ref, atol=2e-2, rtol=2e-2), f"mismatch vs reference: {max_err}"

    print("KERNEL_OK")
</pallas_src>

<mosaic_0001>
module attributes {stable_mosaic.version = 11 : i64} {
  func.func @_self_attention_kernel(%arg0: i32, %arg1: i32, %arg2: memref<1x1xf32, #tpu.memory_space<smem>>, %arg3: memref<1x256xbf16, #tpu.memory_space<vmem>>, %arg4: memref<1x16x256xf32, #tpu.memory_space<vmem>>, %arg5: memref<1x17x256xbf16, #tpu.memory_space<vmem>>, %arg6: memref<1x17x256xbf16, #tpu.memory_space<vmem>>, %arg7: memref<1x16x256xbf16, #tpu.memory_space<vmem>>, %arg8: memref<1x16x256xf32, #tpu.memory_space<vmem>>) attributes {dimension_semantics = [#tpu.dimension_semantics<parallel>, #tpu.dimension_semantics<parallel>], iteration_bounds = array<i64: 2, 1>, scalar_prefetch = 0 : i64, scratch_operands = 0 : i64, tpu.core_type = #tpu.core_type<tc>, window_params = [{transform_indices = @transform_0, window_bounds = array<i64: 1, 1>}, {pipeline_mode = #tpu.pipeline_mode<synchronous>, transform_indices = @transform_1, window_bounds = array<i64: 1, 256>}, {transform_indices = @transform_2, window_bounds = array<i64: 1, 16, 256>}, {transform_indices = @transform_3, window_bounds = array<i64: 1, 17, 256>}, {transform_indices = @transform_4, window_bounds = array<i64: 1, 17, 256>}, {transform_indices = @transform_5, window_bounds = array<i64: 1, 16, 256>}, {transform_indices = @transform_6, window_bounds = array<i64: 1, 16, 256>}]} {
    %c0 = arith.constant 0 : index
    %c0_0 = arith.constant 0 : index
    %c0_1 = arith.constant 0 : index
    %0 = vector.load %arg5[%c0, %c0_0, %c0_1] : memref<1x17x256xbf16, #tpu.memory_space<vmem>>, vector<1x17x256xbf16>
    %1 = vector.shape_cast %0 : vector<1x17x256xbf16> to vector<17x256xbf16>
    %c0_2 = arith.constant 0 : index
    %c0_3 = arith.constant 0 : index
    %c0_4 = arith.constant 0 : index
    %2 = vector.load %arg6[%c0_2, %c0_3, %c0_4] : memref<1x17x256xbf16, #tpu.memory_space<vmem>>, vector<1x17x256xbf16>
    %3 = vector.shape_cast %2 : vector<1x17x256xbf16> to vector<17x256xbf16>
    %cst = arith.constant dense<0.000000e+00> : vector<256x256xf32>
    %4 = tpu.matmul %1, %3, %cst {dimension_numbers = #tpu.dot_dimension_numbers<[0], [0], [1], [1], [0, 1, 1, 1], [], []>} : vector<17x256xbf16>, vector<17x256xbf16>, vector<256x256xf32> -> vector<256x256xf32>
    %cst_5 = arith.constant dense<0xFF800000> : vector<256xf32>
    %5 = vector.multi_reduction <maximumf>, %4, %cst_5 [1] : vector<256x256xf32> to vector<256xf32>
    %6 = vector.shape_cast %5 : vector<256xf32> to vector<256x1xf32>
    %7 = vector.broadcast %6 : vector<256x1xf32> to vector<256x256xf32>
    %8 = arith.subf %4, %7 : vector<256x256xf32>
    %9 = math.exp %8 : vector<256x256xf32>
    %10 = arith.truncf %9 : vector<256x256xf32> to vector<256x256xbf16>
    %c0_6 = arith.constant 0 : index
    %c0_7 = arith.constant 0 : index
    %c0_8 = arith.constant 0 : index
    %11 = vector.load %arg7[%c0_6, %c0_7, %c0_8] : memref<1x16x256xbf16, #tpu.memory_space<vmem>>, vector<1x16x256xbf16>
    %12 = vector.shape_cast %11 : vector<1x16x256xbf16> to vector<16x256xbf16>
    %cst_9 = arith.constant dense<0.000000e+00> : vector<16x256xf32>
    %13 = tpu.matmul %12, %10, %cst_9 {dimension_numbers = #tpu.dot_dimension_numbers<[1], [1], [0], [0], [0, 0, 1, 0], [], []>} : vector<16x256xbf16>, vector<256x256xbf16>, vector<16x256xf32> -> vector<16x256xf32>
    %c0_10 = arith.constant 0 : index
    %c0_11 = arith.constant 0 : index
    %14 = vector.load %arg3[%c0_10, %c0_11] : memref<1x256xbf16, #tpu.memory_space<vmem>>, vector<1x256xbf16>
    %cst_12 = arith.constant dense<0.000000e+00> : vector<1x256xf32>
    %15 = tpu.matmul %14, %10, %cst_12 {dimension_numbers = #tpu.dot_dimension_numbers<[1], [1], [0], [0], [0, 0, 1, 0], [], []>} : vector<1x256xbf16>, vector<256x256xbf16>, vector<1x256xf32> -> vector<1x256xf32>
    %c0_13 = arith.constant 0 : index
    %c0_14 = arith.constant 0 : index
    %16 = memref.load %arg2[%c0_13, %c0_14] : memref<1x1xf32, #tpu.memory_space<smem>>
    %17 = tpu.reciprocal %15 {approx = true} : vector<1x256xf32> -> vector<1x256xf32>
    %18 = vector.broadcast %16 : f32 to vector<1x256xf32>
    %19 = arith.mulf %18, %17 : vector<1x256xf32>
    %20 = vector.broadcast %19 : vector<1x256xf32> to vector<16x256xf32>
    %21 = arith.mulf %13, %20 : vector<16x256xf32>
    %c0_15 = arith.constant 0 : index
    %c0_16 = arith.constant 0 : index
    %c0_17 = arith.constant 0 : index
    %22 = vector.load %arg4[%c0_15, %c0_16, %c0_17] : memref<1x16x256xf32, #tpu.memory_space<vmem>>, vector<1x16x256xf32>
    %23 = vector.shape_cast %22 : vector<1x16x256xf32> to vector<16x256xf32>
    %24 = arith.addf %21, %23 : vector<16x256xf32>
    %c0_18 = arith.constant 0 : index
    %c0_19 = arith.constant 0 : index
    %c0_20 = arith.constant 0 : index
    %25 = vector.load %arg8[%c0_18, %c0_19, %c0_20] : memref<1x16x256xf32, #tpu.memory_space<vmem>>, vector<1x16x256xf32>
    %26 = vector.shape_cast %25 : vector<1x16x256xf32> to vector<16x256xf32>
    %27 = vector.shape_cast %24 : vector<16x256xf32> to vector<1x16x256xf32>
    tpu.vector_store %arg8[%c0_18, %c0_19, %c0_20], %27 {strides = array<i32>} : memref<1x16x256xf32, #tpu.memory_space<vmem>>, vector<1x16x256xf32>,
    return
  }
  func.func @transform_0(%arg0: i32, %arg1: i32) -> (i32, i32) {
    %c0_i32 = arith.constant 0 : i32
    %c0_i32_0 = arith.constant 0 : i32
    %c0_i32_1 = arith.constant 0 : i32
    return %c0_i32, %c0_i32_0 : i32, i32
  }
  func.func @transform_1(%arg0: i32, %arg1: i32) -> (i32, i32) {
    %c0_i32 = arith.constant 0 : i32
    %c0_i32_0 = arith.constant 0 : i32
    %c0_i32_1 = arith.constant 0 : i32
    return %c0_i32, %c0_i32_0 : i32, i32
  }
  func.func @transform_2(%arg0: i32, %arg1: i32) -> (i32, i32, i32) {
    %c0_i32 = arith.constant 0 : i32
    %c0_i32_0 = arith.constant 0 : i32
    return %arg0, %c0_i32, %arg1 : i32, i32, i32
  }
  func.func @transform_3(%arg0: i32, %arg1: i32) -> (i32, i32, i32) {
    %c0_i32 = arith.constant 0 : i32
    %c0_i32_0 = arith.constant 0 : i32
    return %arg0, %c0_i32, %arg1 : i32, i32, i32
  }
  func.func @transform_4(%arg0: i32, %arg1: i32) -> (i32, i32, i32) {
    %c0_i32 = arith.constant 0 : i32
    %c0_i32_0 = arith.constant 0 : i32
    %c0_i32_1 = arith.constant 0 : i32
    return %arg0, %c0_i32, %c0_i32_0 : i32, i32, i32
  }
  func.func @transform_5(%arg0: i32, %arg1: i32) -> (i32, i32, i32) {
    %c0_i32 = arith.constant 0 : i32
    %c0_i32_0 = arith.constant 0 : i32
    %c0_i32_1 = arith.constant 0 : i32
    return %arg0, %c0_i32, %c0_i32_0 : i32, i32, i32
  }
  func.func @transform_6(%arg0: i32, %arg1: i32) -> (i32, i32, i32) {
    %c0_i32 = arith.constant 0 : i32
    %c0_i32_0 = arith.constant 0 : i32
    return %arg0, %c0_i32, %arg1 : i32, i32, i32
  }
}

</mosaic_0001>

<bundles_post_ra>
// kernel: tpu_custom_call.1
= control target key start
LH: loop header
LB: loop body
LE: loop exit
PB: predicated region body
PF: predicated region fallthrough
CT: control target
= control target key end

     0   :  { %s2198_s0 = inlined_call_operand.<no memory space> [shape: f32[1,1], index: 0, kind: input, shape index: {}]   ;;  %s2199_s1 = inlined_call_operand.vmem [shape: bf16[1,256], index: 1, kind: input, shape index: {}]   ;;  %s2200_s2 = inlined_call_operand.vmem [shape: f32[2,16,256], index: 2, kind: input, shape index: {}]   ;;  %s2201_s3 = inlined_call_operand.vmem [shape: bf16[2,17,256], index: 3, kind: input, shape index: {}]   ;;  %s2202_s4 = inlined_call_operand.vmem [shape: bf16[2,17,256], index: 4, kind: input, shape index: {}]   ;;  %s2203_s5 = inlined_call_operand.vmem [shape: bf16[2,16,256], index: 5, kind: input, shape index: {}]   ;;  %s2204_s6 = inlined_call_operand.hbm [shape: f32[2,16,256], index: 6, kind: output, shape index: {}]  }
   0x1   :  { %11 = sst [smem:[#allocation2]] %s2198_s0 }
   0x2   :  { %12 = vsyncpa [#allocation4], 0 }
   0x3   :  { %14 = vsyncpa [#allocation4 + $0x1], 0  ;;  %s1661_s23 = smov 0   ;;  %s1663_s24 = smov 0  }
   0x4   :  { %s1665_s25 = smov 0   ;;  %s1667_s26 = smov 0  }
   0x5   :  { %s1669_s27 = smov 0   ;;  %s1671_s28 = smov 0  }
   0x6 LB: > { %s1267_s0 = sadd.s32 4294967295, %s1618_s28   ;;  %s1268_s29 = sadd.s32 4294967294, %s1618_s28   ;;  %s1618_s28 = sphi %s1671_s28, %s20_s28   ;;  %s1614_s27 = sphi %s1669_s27, %s2268_s27   ;;  %s1610_s26 = sphi %s1667_s26, %s2267_s26   ;;  %s1606_s25 = sphi %s1665_s25, %s2266_s25   ;;  %s1602_s24 = sphi %s1663_s24, %s2265_s24   ;;  %s1598_s23 = sphi %s1661_s23, %s2264_s23  }
   0x7   : > { %s32_s30 = sadd.s32 1, %s1614_s27  ;;  %s191_s7 = sadd.s32 1, %s1606_s25 }
   0x8   : > { %p34_p0 = scmp.ge.s32.totalorder %s32_s30, 2  ;;  %p201_p1 = scmp.ne.s32.totalorder %s1606_s25, %s1602_s24 }
   0x9   : > { %p202_p2 = scmp.eq.s32.totalorder %s1267_s0, 1  ;;  %p207_p3 = scmp.ne.s32.totalorder %s1602_s24, %s1598_s23 }
   0xa   : > { %s2270_s30 = smov (%p34_p0, %s32_s30), 0  ;;  %p208_p5 = scmp.eq.s32.totalorder %s1268_s29, 1 }
   0xb   : > { %p1701_p4 = por %p202_p2, %p201_p1  ;;  %s186_s9 = ssub.s32 %s1614_s27, %s2270_s30 }
   0xc   : > { %p1271_p6 = scmp.ge.s32.totalorder %s1618_s28, 1  ;;  %p189_p7 = scmp.eq.s32.totalorder %s186_s9, 0 }
   0xd   : > { %p1708_p8 = por %p208_p5, %p207_p3  ;;  %p274_p9 = scmp.lt.s32.totalorder %s1618_s28, 3 }
   0xe   : > { %s1714_s11 = scalar_select %p189_p7, %s1606_s25, %s191_s7  }
   0xf   : > { %p275_p10 = pnand %p1271_p6, %p274_p9 }
  0x11   : > { %278 = sbr.rel (%p275_p10) target bundleno = 1114 (0x45a), region = 44 }
  0x16   : > { %p328_p11 = scmp.lt.s32.totalorder %s1610_s26, 1  ;;  %vm470_vm0 = vcmask 1040384   ;;  %v1620_v8 = vmov 0   ;;  %vm421_vm1 = vcmask 138240   ;;  %s2150_s9 = sld [smem:[#allocation2]] }
  0x17   : > { %v472_v9 = vsel %vm470_vm0, 65535, %v1620_v8  ;;  %s324_s14 = sand.u32 1, %s1602_s24  }
  0x18   : > { %s1718_s12 = scalar_select %p328_p11, %s1610_s26, 1 }
  0x19   : > { %s1272_s18 = sshll.u32 %s324_s14, 5 }
  0x1a   : > { %s1349_s13 = smul.u32 24, %s1718_s12  ;;  %s1341_s20 = sshll.u32 %s1718_s12, 4 }
  0x1b   : > { %s356_s0 = scalar_lea.vmem %s2203_s5, %s1341_s20 }
  0x1c   : > { %s345_s16 = scalar_lea.vmem %s2201_s3, %s1349_s13  ;;  %s351_s19 = scalar_lea.vmem %s2202_s4, %s1349_s13 }
  0x1d   : > { %v1342_v0 = vld [vmem:[%s345_s16 + $0x4] sm:$0xf]  ;;  %v1281_v1 = vld [vmem:[%s345_s16] sm:$0xf]  ;;  %v1283_v2 = vld [vmem:[%s345_s16 + $0x8] sm:$0xf0] }
  0x1e   : > { %v1343_v3 = vld [vmem:[%s345_s16 + $0x4] sm:$0xf0]  ;;  %v1286_v4 = vor.u32 %v1342_v0, %v1283_v2  ;;  %v364_v5 = vld [vmem:[%s351_s19 + $0x10] sm:$0x11]  ;;  %v1289_v13 = vld [vmem:[%s351_s19] sm:$0xf] }
  0x1f   : > { %v1282_v6 = vor.u32 %v1343_v3, %v1281_v1  ;;  %v413_v7 = vunpack.c.l.b16 %v364_v5  ;;  %v414_v10 = vunpack.c.h.b16 %v364_v5  ;;  %v1345_v14 = vld [vmem:[%s351_s19 + $0x4] sm:$0xf0]  ;;  %v1344_v16 = vld [vmem:[%s351_s19 + $0x4] sm:$0xf]  ;;  %v1291_v17 = vld [vmem:[%s351_s19 + $0x8] sm:$0xf0] }
  0x20   : > { %v1290_v19 = vor.u32 %v1345_v14, %v1289_v13  ;;  %v361_v20 = vld [vmem:[%s345_s16 + $0x10] sm:$0x11]  ;;  %v1294_v21 = vor.u32 %v1344_v16, %v1291_v17  ;;  %s1340_s13 = sshll.u32 %s1718_s12, 5  ;;  %s326_s12 = scalar_lea.vmem [#allocation3], %s1272_s18 }
  0x21   : > { %382 = vxpose.binary.xlu0.c.b16.start [1/4] (short) %v1286_v4, %v1282_v6, 128  ;;  %v417_v11 = vpack.c.b16 %v413_v7, %v413_v7  ;;  %v418_v12 = vpack.c.b16 %v414_v10, %v414_v10  ;;  %v372_v22 = vunpack.c.l.b16 %v361_v20  ;;  %v373_v23 = vunpack.c.h.b16 %v361_v20  ;;  %s335_s17 = scalar_lea.vmem %s2200_s2, %s1340_s13  ;;  %s1348_s19 = sshll.u32 %s1610_s26, 5 }
  0x22   : > { %s1142_s22 = scalar_lea.hbm %s2204_s6, %s1348_s19  ;;  %s1129_s26 = scalar_lea.sflag [#allocation4], %s324_s14 }
  0x23   : > { %v474_v15 = vand.u32 %v472_v9, %v417_v11  ;;  %v477_v18 = vand.u32 %v472_v9, %v418_v12  ;;  %v376_v24 = vpack.c.b16 %v372_v22, %v372_v22  ;;  %v377_v25 = vpack.c.b16 %v373_v23, %v373_v23  ;;  %s1145_s29 = sshll.u32 %s1142_s22, 4  ;;  %s1560_s16 = scalar_lea.hbm %s2204_s6, 64  ;;  %s1146_s29 = int_to_ptr.hbm [resolvable:$true] %s1145_s29 }
  0x24   : > { %s1554_s7 = sshra.s32 %s1146_s29, 4  ;;  %s1555_s7 = int_to_ptr.hbm [resolvable:$true] %s1554_s7 }
  0x25   : > { %485 = vmatpush.bf16.msra.mxu0 %v474_v15  ;;  %574 = vmatpush.bf16.msra.mxu1 %v477_v18  ;;  %p1561_p1 = scmp.lt.s32.totalorder %s1555_s7, %s2204_s6 }
  0x29   : > { %486 = vmatpush.bf16.msra.mxu0 %v1290_v19  ;;  %575 = vmatpush.bf16.msra.mxu1 %v1294_v21 }
  0x31   : > { %383 = vxpose.binary.xlu0.c.b16.end [2/4] (short) %v377_v25, %v376_v24, 128 }
  0xcd   : > { %v390_v26 = vpop.trf.xlu0 }
  0xce   : > { %1295 = vmatmul.msk.bf16.vlgmr.msra.gmra.mxu0 %vm421_vm1, %v390_v26  ;;  %1311 = vmatmul.msk.bf16.vlgmr.msra.gmra.mxu1 %vm421_vm1, %v390_v26 }
  0xd5   : > { %v391_v27 = vpop.trf.xlu0 }
  0xdd   : > { %v392_v28 = vpop.trf.xlu0 }
  0xde   : > { %1296 = vmatmul.msk.bf16.gmra.mxu0 %vm421_vm1, %v392_v28  ;;  %1312 = vmatmul.msk.bf16.gmra.mxu1 %vm421_vm1, %v392_v28 }
  0xe5   : > { %v393_v29 = vpop.trf.xlu0 }
  0xed   : > { %v394_v30 = vpop.trf.xlu0 }
  0xee   : > { %1297 = vmatmul.msk.bf16.gmra.mxu0 %vm421_vm1, %v394_v30  ;;  %1313 = vmatmul.msk.bf16.gmra.mxu1 %vm421_vm1, %v394_v30 }
  0xf5   : > { %v395_v31 = vpop.trf.xlu0 }
  0xfd   : > { %v396_v32 = vpop.trf.xlu0 }
  0xfe   : > { %1298 = vmatmul.msk.bf16.gmra.mxu0 %vm421_vm1, %v396_v32  ;;  %1314 = vmatmul.msk.bf16.gmra.mxu1 %vm421_vm1, %v396_v32 }
 0x105   : > { %v397_v33 = vpop.trf.xlu0 }
 0x10d   : > { %v398_v34 = vpop.trf.xlu0 }
 0x10e   : > { %1299 = vmatmul.msk.bf16.gmra.mxu0 %vm421_vm1, %v398_v34  ;;  %1315 = vmatmul.msk.bf16.gmra.mxu1 %vm421_vm1, %v398_v34 }
 0x115   : > { %v399_v35 = vpop.trf.xlu0 }
 0x11d   : > { %v400_v36 = vpop.trf.xlu0 }
 0x11e   : > { %1300 = vmatmul.msk.bf16.gmra.mxu0 %vm421_vm1, %v400_v36  ;;  %1316 = vmatmul.msk.bf16.gmra.mxu1 %vm421_vm1, %v400_v36 }
 0x125   : > { %v401_v37 = vpop.trf.xlu0 }
 0x12d   : > { %v402_v38 = vpop.trf.xlu0 }
 0x12e   : > { %1301 = vmatmul.msk.bf16.gmra.mxu0 %vm421_vm1, %v402_v38  ;;  %1317 = vmatmul.msk.bf16.gmra.mxu1 %vm421_vm1, %v402_v38 }
 0x135   : > { %v403_v39 = vpop.trf.xlu0 }
 0x13d   : > { %v404_v40 = vpop.trf.xlu0 }
 0x13e   : > { %1302 = vmatmul.msk.bf16.gmra.mxu0 %vm421_vm1, %v404_v40  ;;  %1318 = vmatmul.msk.bf16.gmra.mxu1 %vm421_vm1, %v404_v40 }
 0x145   : > { %v405_v11 = vpop.trf.xlu0 }
 0x14b   : > { %v1743_v41 = vpop.f32.mrf.mxu0  ;;  %v1745_v42 = vpop.f32.mrf.mxu1 }
 0x14e   : > { %1303 = vmatmul.msk.bf16.gmra.mxu0 %vm421_vm1, %v391_v27  ;;  %1319 = vmatmul.msk.bf16.gmra.mxu1 %vm421_vm1, %v391_v27 }
 0x153   : > { %v1749_v43 = vpop.f32.mrf.mxu0  ;;  %v1751_v44 = vpop.f32.mrf.mxu1 }
 0x154   : > { %2226 = vst [vmem:[#allocation6_spill] sm:$0xff] %v1749_v43 }
 0x15b   : > { %v1753_v45 = vpop.f32.mrf.mxu0  ;;  %v1755_v46 = vpop.f32.mrf.mxu1 }
 0x15e   : > { %1304 = vmatmul.msk.bf16.gmra.mxu0 %vm421_vm1, %v393_v29  ;;  %1320 = vmatmul.msk.bf16.gmra.mxu1 %vm421_vm1, %v393_v29 }
 0x163   : > { %v1759_v47 = vpop.f32.mrf.mxu0  ;;  %v1761_v48 = vpop.f32.mrf.mxu1 }
 0x16b   : > { %v1763_v49 = vpop.f32.mrf.mxu0  ;;  %v1765_v50 = vpop.f32.mrf.mxu1 }
 0x16e   : > { %1305 = vmatmul.msk.bf16.gmra.mxu0 %vm421_vm1, %v395_v31  ;;  %1321 = vmatmul.msk.bf16.gmra.mxu1 %vm421_vm1, %v395_v31 }
 0x173   : > { %v1769_v51 = vpop.f32.mrf.mxu0  ;;  %v1771_v52 = vpop.f32.mrf.mxu1 }
 0x17b   : > { %v1773_v53 = vpop.f32.mrf.mxu0  ;;  %v1775_v54 = vpop.f32.mrf.mxu1 }
 0x17c   : > { %2227 = vst [vmem:[#allocation7_spill] sm:$0xff] %v1773_v53 }
 0x17d   : > { %2228 = vst [vmem:[#allocation8_spill] sm:$0xff] %v1775_v54 }
 0x17e   : > { %1306 = vmatmul.msk.bf16.gmra.mxu0 %vm421_vm1, %v397_v33  ;;  %1322 = vmatmul.msk.bf16.gmra.mxu1 %vm421_vm1, %v397_v33 }
 0x183   : > { %v1779_v55 = vpop.f32.mrf.mxu0  ;;  %v1781_v56 = vpop.f32.mrf.mxu1 }
 0x18b   : > { %v1783_v57 = vpop.f32.mrf.mxu0  ;;  %v1785_v58 = vpop.f32.mrf.mxu1 }
 0x18c   : > { %v681_v12 = vmax.f32 %v1783_v57, %v1785_v58 }
 0x18e   : > { %1307 = vmatmul.msk.bf16.gmra.mxu0 %vm421_vm1, %v399_v35  ;;  %1323 = vmatmul.msk.bf16.gmra.mxu1 %vm421_vm1, %v399_v35 }
 0x193   : > { %v1789_v59 = vpop.f32.mrf.mxu0  ;;  %v1791_v60 = vpop.f32.mrf.mxu1 }
 0x194   : > { %v684_v19 = vmax.f32 %v1789_v59, %v1791_v60 }
 0x19b   : > { %v1793_v61 = vpop.f32.mrf.mxu0  ;;  %v1795_v62 = vpop.f32.mrf.mxu1 }
 0x19c   : > { %v687_v63 = vmax.f32 %v1793_v61, %v1795_v62 }
 0x19e   : > { %688 = vmax.xlane.f32.xlu1 %v687_v63  ;;  %1308 = vmatmul.msk.bf16.gmra.mxu0 %vm421_vm1, %v401_v37 }
 0x19f   : > { %1324 = vmatmul.msk.bf16.gmra.mxu1 %vm421_vm1, %v401_v37 }
 0x1a3   : > { %v1801_v0 = vpop.f32.mrf.mxu0  ;;  %v1803_v1 = vpop.f32.mrf.mxu1 }
 0x1a4   : > { %v690_v2 = vmax.f32 %v1801_v0, %v1803_v1 }
 0x1a6   : > { %691 = vmax.xlane.f32.xlu2 %v690_v2 }
 0x1ab   : > { %v1807_v3 = vpop.f32.mrf.mxu0  ;;  %v1809_v4 = vpop.f32.mrf.mxu1 }
 0x1ac   : > { %v693_v5 = vmax.f32 %v1807_v3, %v1809_v4 }
 0x1ae   : > { %694 = vmax.xlane.f32.xlu2 %v693_v5  ;;  %1309 = vmatmul.msk.bf16.gmra.mxu0 %vm421_vm1, %v403_v39 }
 0x1af   : > { %1325 = vmatmul.msk.bf16.gmra.mxu1 %vm421_vm1, %v403_v39 }
 0x1b3   : > { %v1815_v6 = vpop.f32.mrf.mxu0  ;;  %v1817_v7 = vpop.f32.mrf.mxu1 }
 0x1b4   : > { %v696_v8 = vmax.f32 %v1815_v6, %v1817_v7 }
 0x1b6   : > { %697 = vmax.xlane.f32.xlu2 %v696_v8 }
 0x1bb   : > { %v523_v9 = vpop.f32.mrf.mxu0  ;;  %v612_v10 = vpop.f32.mrf.mxu1 }
 0x1bc   : > { %v699_v13 = vmax.f32 %v523_v9, %v612_v10 }
 0x1be   : > { %682 = vmax.xlane.f32.xlu2 %v681_v12  ;;  %700 = vmax.xlane.f32.xlu1 %v699_v13 }
 0x1bf   : > { %1310 = vmatmul.msk.bf16.gmra.mxu0 %vm421_vm1, %v405_v11  ;;  %1326 = vmatmul.msk.bf16.gmra.mxu1 %vm421_vm1, %v405_v11 }
 0x1c3   : > { %v525_v14 = vpop.f32.mrf.mxu0  ;;  %v614_v15 = vpop.f32.mrf.mxu1 }
 0x1c4   : > { %v702_v16 = vmax.f32 %v525_v14, %v614_v15 }
 0x1c6   : > { %703 = vmax.xlane.f32.xlu1 %v702_v16 }
 0x1cb   : > { %v1825_v17 = vpop.f32.mrf.mxu0  ;;  %v1827_v18 = vpop.f32.mrf.mxu1 }
 0x1cc   : > { %2229 = vst [vmem:[#allocation9_spill] sm:$0xff] %v1825_v17 }
 0x1cd   : > { %2230 = vst [vmem:[#allocation10_spill] sm:$0xff] %v1827_v18 }
 0x1ce   : > { %685 = vmax.xlane.f32.xlu1 %v684_v19 }
 0x1d3   : > { %v1831_v20 = vpop.f32.mrf.mxu0  ;;  %v1833_v21 = vpop.f32.mrf.mxu1 }
 0x1d4   : > { %2231 = vst [vmem:[#allocation11_spill] sm:$0xff] %v1831_v20 }
 0x1d5   : > { %2232 = vst [vmem:[#allocation12_spill] sm:$0xff] %v1833_v21 }
 0x1db   : > { %v1835_v22 = vpop.f32.mrf.mxu0  ;;  %v1837_v23 = vpop.f32.mrf.mxu1 }
 0x1e3   : > { %v1839_v24 = vpop.f32.mrf.mxu0  ;;  %v1841_v25 = vpop.f32.mrf.mxu1 }
 0x1e4   : > { %2233 = vst [vmem:[#allocation13_spill] sm:$0xff] %v1839_v24 }
 0x1e5   : > { %2234 = vst [vmem:[#allocation14_spill] sm:$0xff] %v1841_v25  ;;  %v675_v25 = vmax.f32 %v1773_v53, %v1775_v54 }
 0x1eb   : > { %v1843_v26 = vpop.f32.mrf.mxu0  ;;  %v1845_v27 = vpop.f32.mrf.mxu1 }
 0x1f3   : > { %v1847_v28 = vpop.f32.mrf.mxu0  ;;  %v1849_v29 = vpop.f32.mrf.mxu1 }
 0x1f4   : > { %2235 = vst [vmem:[#allocation15_spill] sm:$0xff] %v1847_v28 }
 0x1f5   : > { %2236 = vst [vmem:[#allocation16_spill] sm:$0xff] %v1849_v29 }
 0x1fb   : > { %v1851_v30 = vpop.f32.mrf.mxu0  ;;  %v1853_v31 = vpop.f32.mrf.mxu1 }
 0x203   : > { %v1855_v32 = vpop.f32.mrf.mxu0  ;;  %v1857_v33 = vpop.f32.mrf.mxu1 }
 0x20b   : > { %v1859_v34 = vpop.f32.mrf.mxu0  ;;  %v1861_v35 = vpop.f32.mrf.mxu1 }
 0x211   : > { %v1877_v5 = vpop.xlane.xlu1 %688 }
 0x213   : > { %v1863_v36 = vpop.f32.mrf.mxu0  ;;  %v1865_v37 = vpop.f32.mrf.mxu1 }
 0x219   : > { %v1875_v2 = vpop.xlane.xlu2 %691 }
 0x21b   : > { %v1867_v38 = vpop.f32.mrf.mxu0 }
 0x21c   : > { %v1869_v39 = vpop.f32.mrf.mxu1 }
 0x221   : > { %v695_v13 = vpop.xlane.xlu2 %694 }
 0x223   : > { %v1871_v40 = vpop.f32.mrf.mxu0 }
 0x224   : > { %v1873_v63 = vpop.f32.mrf.mxu1 }
 0x229   : > { %v698_v17 = vpop.xlane.xlu2 %697 }
 0x22a   : > { %v779_v43 = vsub.f32 %v1815_v6, %v698_v17  ;;  %v778_v6 = vsub.f32 %v1809_v4, %v695_v13  ;;  %v776_v4 = vsub.f32 %v1803_v1, %v1875_v2 }
 0x22b   : > { %v1879_v8 = vpop.f32.mrf.mxu0 }
 0x22c   : > { %2237 = vst [vmem:[#allocation17_spill] sm:$0xff] %v1879_v8  ;;  %v1881_v11 = vpop.f32.mrf.mxu1  ;;  %v863_v1 = vmul.f32 1.442695, %v776_v4 }
 0x22d   : > { %2238 = vst [vmem:[#allocation18_spill] sm:$0xff] %v1881_v11  ;;  %v741_v12 = vmax.f32 %v1879_v8, %v1881_v11 }
 0x22f   : > { %742 = vmax.xlane.f32.xlu2 %v741_v12 }
 0x231   : > { %v701_v16 = vpop.xlane.xlu1 %700 }
 0x232   : > { %v781_v20 = vsub.f32 %v523_v9, %v701_v16  ;;  %v782_v24 = vsub.f32 %v612_v10, %v701_v16  ;;  %v678_v9 = vmax.f32 %v1779_v55, %v1781_v56 }
 0x233   : > { %v1885_v19 = vpop.f32.mrf.mxu0 }
 0x234   : > { %v1887_v21 = vpop.f32.mrf.mxu1  ;;  %v873_v29 = vmul.f32 1.442695, %v781_v20  ;;  %v875_v11 = vmul.f32 1.442695, %v782_v24  ;;  %v735_v20 = vmax.f32 %v1867_v38, %v1869_v39 }
 0x235   : > { %v744_v28 = vmax.f32 %v1885_v19, %v1887_v21 }
 0x236   : > { %1408 = vpow2.f32 %v873_v29  ;;  %v867_v29 = vmul.f32 1.442695, %v778_v6 }
 0x237   : > { %676 = vmax.xlane.f32.xlu2 %v675_v25  ;;  %745 = vmax.xlane.f32.xlu1 %v744_v28  ;;  %v780_v25 = vsub.f32 %v1817_v7, %v698_v17  ;;  %1410 = vpow2.f32 %v875_v11  ;;  %v775_v11 = vsub.f32 %v1801_v0, %v1875_v2  ;;  %v774_v0 = vsub.f32 %v1795_v62, %v1877_v5 }
 0x239   : > { %v704_v8 = vpop.xlane.xlu1 %703  ;;  %v871_v24 = vmul.f32 1.442695, %v780_v25 }
 0x23a   : > { %v783_v12 = vsub.f32 %v525_v14, %v704_v8  ;;  %v784_v18 = vsub.f32 %v614_v15, %v704_v8  ;;  %v777_v15 = vsub.f32 %v1807_v3, %v695_v13  ;;  %v669_v3 = vmax.f32 %v1763_v49, %v1765_v50 }
 0x23c   : > { %v877_v10 = vmul.f32 1.442695, %v783_v12  ;;  %v879_v16 = vmul.f32 1.442695, %v784_v18  ;;  %v1896_v54 = vpop.f32.mrf.mxu0  ;;  %v1898_v53 = vpop.f32.mrf.mxu1  ;;  %v869_v18 = vmul.f32 1.442695, %v779_v43  ;;  %v738_v43 = vmax.f32 %v1871_v40, %v1873_v63 }
 0x23d   : > { %v747_v14 = vmax.f32 %v1896_v54, %v1898_v53  ;;  %v1409_v28 = vpop.eup %1408  ;;  %v865_v7 = vmul.f32 1.442695, %v777_v15  ;;  %v683_v15 = vpop.xlane.xlu2 %682 }
 0x23e   : > { %1412 = vpow2.f32 %v877_v10  ;;  %v1411_v17 = vpop.eup %1410 }
 0x23f   : > { %1414 = vpow2.f32 %v879_v16  ;;  %736 = vmax.xlane.f32.xlu2 %v735_v20  ;;  %679 = vmax.xlane.f32.xlu1 %v678_v9  ;;  %v773_v9 = vsub.f32 %v1793_v61, %v1877_v5  ;;  %v861_v16 = vmul.f32 1.442695, %v775_v11  ;;  %v859_v61 = vmul.f32 1.442695, %v774_v0 }
 0x240   : > { %748 = vmax.xlane.f32.xlu0 %v747_v14  ;;  %1416 = vpow2.f32 %v869_v18 }
 0x241   : > { %1418 = vpow2.f32 %v871_v24  ;;  %v686_v2 = vpop.xlane.xlu1 %685  ;;  %v857_v20 = vmul.f32 1.442695, %v773_v9  ;;  %v729_v24 = vmax.f32 %v1859_v34, %v1861_v35 }
 0x242   : > { %1420 = vpow2.f32 %v865_v7  ;;  %v771_v18 = vsub.f32 %v1789_v59, %v686_v2  ;;  %v772_v5 = vsub.f32 %v1791_v60, %v686_v2  ;;  %v769_v7 = vsub.f32 %v1783_v57, %v683_v15 }
 0x243   : > { %1422 = vpow2.f32 %v867_v29  ;;  %v770_v59 = vsub.f32 %v1785_v58, %v683_v15  ;;  %v723_v15 = vmax.f32 %v1851_v30, %v1853_v31 }
 0x244   : > { %v1413_v8 = vpop.eup %1412  ;;  %1424 = vpow2.f32 %v861_v16  ;;  %v855_v60 = vmul.f32 1.442695, %v772_v5  ;;  %v1941_v57 = vpop.f32.mrf.mxu1  ;;  %v663_v16 = vmax.f32 %v1753_v45, %v1755_v46  ;;  %v657_v5 = vmax.f32 %v1743_v41, %v1745_v42 }
 0x245   : > { %v1415_v12 = vpop.eup %1414  ;;  %v1915_v13 = vpack.c.bf16 %v1413_v8, %v1409_v28  ;;  %1426 = vpow2.f32 %v863_v1  ;;  %v672_v28 = vmax.f32 %v1769_v51, %v1771_v52  ;;  %v853_v8 = vmul.f32 1.442695, %v771_v18 }
 0x246   : > { %v1919_v10 = vpack.c.bf16 %v1415_v12, %v1411_v17  ;;  %v1417_v25 = vpop.eup %1416  ;;  %1428 = vpow2.f32 %v857_v20  ;;  %v1939_v12 = vpop.f32.mrf.mxu0 }
 0x247   : > { %670 = vmax.xlane.f32.xlu2 %v669_v3  ;;  %739 = vmax.xlane.f32.xlu1 %v738_v43  ;;  %v1419_v14 = vpop.eup %1418  ;;  %1430 = vpow2.f32 %v859_v61  ;;  %v849_v3 = vmul.f32 1.442695, %v769_v7  ;;  %v851_v43 = vmul.f32 1.442695, %v770_v59  ;;  %v750_v58 = vmax.f32 %v1939_v12, %v1941_v57 }
 0x248   : > { %989 = vmatpush.bf16.xpose.msra.mxu2 %v1915_v13  ;;  %1003 = vmatpush.bf16.xpose.msra.mxu3 %v1919_v10  ;;  %v1421_v6 = vpop.eup %1420  ;;  %1432 = vpow2.f32 %v853_v8  ;;  %v726_v7 = vmax.f32 %v1855_v32, %v1857_v33  ;;  %v711_v59 = vmax.f32 %v1835_v22, %v1837_v23  ;;  %v2245_v8 = vld [vmem:[#allocation6_spill] sm:$0xff] }
 0x249   : > { %v1423_v62 = vpop.eup %1422  ;;  %v1932_v17 = vpack.c.bf16 %v1417_v25, %v1421_v6  ;;  %1434 = vpow2.f32 %v855_v60  ;;  %v732_v6 = vmax.f32 %v1863_v36, %v1865_v37  ;;  %v660_v60 = vmax.f32 %v2245_v8, %v1751_v44 }
 0x24a   : > { %v1934_v29 = vpack.c.bf16 %v1419_v14, %v1423_v62  ;;  %v1425_v11 = vpop.eup %1424  ;;  %1436 = vpow2.f32 %v849_v3  ;;  %v2247_v3 = vld [vmem:[#allocation9_spill] sm:$0xff] }
 0x24b   : > { %2239 = vst [vmem:[#allocation19_spill] sm:$0xff] %v1932_v17  ;;  %v1427_v4 = vpop.eup %1426  ;;  %1438 = vpow2.f32 %v851_v43  ;;  %v2248_v43 = vld [vmem:[#allocation16_spill] sm:$0xff] }
 0x24c   : > { %2240 = vst [vmem:[#allocation20_spill] sm:$0xff] %v1934_v29  ;;  %v1429_v9 = vpop.eup %1428 }
 0x24d   : > { %v1431_v0 = vpop.eup %1430  ;;  %v1947_v1 = vpack.c.bf16 %v1425_v11, %v1429_v9  ;;  %v2246_v11 = vld [vmem:[#allocation10_spill] sm:$0xff]  ;;  %v2249_v9 = vld [vmem:[#allocation15_spill] sm:$0xff] }
 0x24e   : > { %v1949_v2 = vpack.c.bf16 %v1427_v4, %v1431_v0  ;;  %v1433_v25 = vpop.eup %1432  ;;  %v705_v4 = vmax.f32 %v2247_v3, %v2246_v11  ;;  %v720_v0 = vmax.f32 %v2249_v9, %v2248_v43 }
 0x24f   : > { %730 = vmax.xlane.f32.xlu2 %v729_v24  ;;  %673 = vmax.xlane.f32.xlu1 %v672_v28  ;;  %2241 = vst [vmem:[#allocation21_spill] sm:$0xff] %v1947_v1  ;;  %v1435_v20 = vpop.eup %1434  ;;  %v666_v24 = vmax.f32 %v1759_v47, %v1761_v48  ;;  %v717_v28 = vmax.f32 %v1843_v26, %v1845_v27 }
 0x250   : > { %990 = vmatpush.bf16.xpose.msra.mxu2 %v1932_v17  ;;  %1004 = vmatpush.bf16.xpose.msra.mxu3 %v1934_v29  ;;  %2242 = vst [vmem:[#allocation22_spill] sm:$0xff] %v1949_v2  ;;  %v1437_v14 = vpop.eup %1436 }
 0x251   : > { %v1439_v61 = vpop.eup %1438  ;;  %v1957_v18 = vpack.c.bf16 %v1433_v25, %v1437_v14  ;;  %v2253_v14 = vld [vmem:[#allocation11_spill] sm:$0xff] }
 0x252   : > { %v1959_v62 = vpack.c.bf16 %v1435_v20, %v1439_v61  ;;  %v2252_v20 = vld [vmem:[#allocation12_spill] sm:$0xff] }
 0x253   : > { %2243 = vst [vmem:[#allocation23_spill] sm:$0xff] %v1957_v18  ;;  %v708_v61 = vmax.f32 %v2253_v14, %v2252_v20 }
 0x254   : > { %2244 = vst [vmem:[#allocation24_spill] sm:$0xff] %v1959_v62 }
 0x257   : > { %664 = vmax.xlane.f32.xlu2 %v663_v16  ;;  %751 = vmax.xlane.f32.xlu1 %v750_v58  ;;  %v2250_v58 = vld [vmem:[#allocation14_spill] sm:$0xff]  ;;  %v2251_v16 = vld [vmem:[#allocation13_spill] sm:$0xff] }
 0x258   : > { %991 = vmatpush.bf16.xpose.msra.mxu2 %v1947_v1  ;;  %1005 = vmatpush.bf16.xpose.msra.mxu3 %v1949_v2  ;;  %v714_v25 = vmax.f32 %v2251_v16, %v2250_v58 }
 0x25f   : > { %724 = vmax.xlane.f32.xlu2 %v723_v15  ;;  %733 = vmax.xlane.f32.xlu1 %v732_v6  ;;  %v2254_v6 = vld [vmem:[#allocation17_spill] sm:$0xff] }
 0x260   : > { %992 = vmatpush.bf16.xpose.msra.mxu2 %v1957_v18  ;;  %1006 = vmatpush.bf16.xpose.msra.mxu3 %v1959_v62 }
 0x267   : > { %658 = vmax.xlane.f32.xlu2 %v657_v5  ;;  %667 = vmax.xlane.f32.xlu1 %v666_v24  ;;  %v2255_v24 = vld [vmem:[#allocation18_spill] sm:$0xff] }
 0x26f   : > { %718 = vmax.xlane.f32.xlu2 %v717_v28  ;;  %727 = vmax.xlane.f32.xlu1 %v726_v7 }
 0x277   : > { %712 = vmax.xlane.f32.xlu2 %v711_v59  ;;  %661 = vmax.xlane.f32.xlu1 %v660_v60 }
 0x27f   : > { %706 = vmax.xlane.f32.xlu2 %v705_v4  ;;  %721 = vmax.xlane.f32.xlu1 %v720_v0 }
 0x287   : > { %715 = vmax.xlane.f32.xlu1 %v714_v25  ;;  %v2256_v25 = vld [vmem:[#allocation7_spill] sm:$0xff] }
 0x28f   : > { %709 = vmax.xlane.f32.xlu1 %v708_v61  ;;  %v2257_v61 = vld [vmem:[#allocation8_spill] sm:$0xff] }
 0x2a2   : > { %v743_v15 = vpop.xlane.xlu2 %742 }
 0x2a3   : > { %v809_v5 = vsub.f32 %v2254_v6, %v743_v15  ;;  %v810_v28 = vsub.f32 %v2255_v24, %v743_v15 }
 0x2a5   : > { %v929_v60 = vmul.f32 1.442695, %v809_v5  ;;  %v931_v0 = vmul.f32 1.442695, %v810_v28 }
 0x2a7   : > { %1440 = vpow2.f32 %v929_v60 }
 0x2a8   : > { %1442 = vpow2.f32 %v931_v0 }
 0x2aa   : > { %v677_v7 = vpop.xlane.xlu2 %676  ;;  %v746_v59 = vpop.xlane.xlu1 %745 }
 0x2ab   : > { %v811_v62 = vsub.f32 %v1885_v19, %v746_v59  ;;  %v812_v4 = vsub.f32 %v1887_v21, %v746_v59  ;;  %v765_v1 = vsub.f32 %v2256_v25, %v677_v7  ;;  %v766_v29 = vsub.f32 %v2257_v61, %v677_v7 }
 0x2ad   : > { %v933_v18 = vmul.f32 1.442695, %v811_v62  ;;  %v935_v2 = vmul.f32 1.442695, %v812_v4  ;;  %v841_v24 = vmul.f32 1.442695, %v765_v1  ;;  %v1441_v21 = vpop.eup %1440 }
 0x2ae   : > { %v843_v17 = vmul.f32 1.442695, %v766_v29  ;;  %v1443_v62 = vpop.eup %1442 }
 0x2af   : > { %1444 = vpow2.f32 %v933_v18 }
 0x2b0   : > { %1446 = vpow2.f32 %v935_v2 }
 0x2b1   : > { %1448 = vpow2.f32 %v841_v24 }
 0x2b2   : > { %v737_v6 = vpop.xlane.xlu2 %736  ;;  %v680_v15 = vpop.xlane.xlu1 %679  ;;  %1450 = vpow2.f32 %v843_v17 }
 0x2b3   : > { %v767_v5 = vsub.f32 %v1779_v55, %v680_v15  ;;  %v768_v19 = vsub.f32 %v1781_v56, %v680_v15  ;;  %v805_v4 = vsub.f32 %v1867_v38, %v737_v6  ;;  %v806_v2 = vsub.f32 %v1869_v39, %v737_v6 }
 0x2b5   : > { %v845_v28 = vmul.f32 1.442695, %v767_v5  ;;  %v847_v59 = vmul.f32 1.442695, %v768_v19  ;;  %v1445_v60 = vpop.eup %1444  ;;  %v921_v56 = vmul.f32 1.442695, %v805_v4 }
 0x2b6   : > { %v1447_v0 = vpop.eup %1446  ;;  %v1993_v18 = vpack.c.bf16 %v1445_v60, %v1441_v21  ;;  %v923_v7 = vmul.f32 1.442695, %v806_v2 }
 0x2b7   : > { %1452 = vpow2.f32 %v845_v28  ;;  %v1995_v1 = vpack.c.bf16 %v1447_v0, %v1443_v62  ;;  %v1449_v15 = vpop.eup %1448 }
 0x2b8   : > { %1454 = vpow2.f32 %v847_v59  ;;  %v1451_v24 = vpop.eup %1450 }
 0x2b9   : > { %1456 = vpow2.f32 %v921_v56 }
 0x2ba   : > { %v740_v55 = vpop.xlane.xlu1 %739  ;;  %v671_v25 = vpop.xlane.xlu2 %670  ;;  %1458 = vpow2.f32 %v923_v7 }
 0x2bb   : > { %v807_v29 = vsub.f32 %v1871_v40, %v740_v55  ;;  %v808_v61 = vsub.f32 %v1873_v63, %v740_v55  ;;  %v761_v39 = vsub.f32 %v1763_v49, %v671_v25  ;;  %v762_v19 = vsub.f32 %v1765_v50, %v671_v25 }
 0x2bd   : > { %v925_v38 = vmul.f32 1.442695, %v807_v29  ;;  %v927_v17 = vmul.f32 1.442695, %v808_v61  ;;  %v1453_v5 = vpop.eup %1452  ;;  %v833_v28 = vmul.f32 1.442695, %v761_v39 }
 0x2be   : > { %v1455_v6 = vpop.eup %1454  ;;  %v2001_v21 = vpack.c.bf16 %v1453_v5, %v1449_v15  ;;  %v835_v59 = vmul.f32 1.442695, %v762_v19 }
 0x2bf   : > { %1460 = vpow2.f32 %v925_v38  ;;  %v2003_v40 = vpack.c.bf16 %v1455_v6, %v1451_v24  ;;  %v1457_v60 = vpop.eup %1456 }
 0x2c0   : > { %1462 = vpow2.f32 %v927_v17  ;;  %993 = vmatpush.bf16.xpose.msra.mxu2 %v2001_v21  ;;  %v1459_v50 = vpop.eup %1458 }
 0x2c1   : > { %1007 = vmatpush.bf16.xpose.msra.mxu3 %v2003_v40  ;;  %1464 = vpow2.f32 %v833_v28 }
 0x2c2   : > { %v674_v63 = vpop.xlane.xlu1 %673  ;;  %v2009_v0 = vpop.xlane.xlu2 %730  ;;  %1466 = vpow2.f32 %v835_v59 }
 0x2c3   : > { %v763_v62 = vsub.f32 %v1769_v51, %v674_v63  ;;  %v764_v49 = vsub.f32 %v1771_v52, %v674_v63 }
 0x2c5   : > { %v837_v4 = vmul.f32 1.442695, %v763_v62  ;;  %v839_v2 = vmul.f32 1.442695, %v764_v49  ;;  %v1461_v55 = vpop.eup %1460 }
 0x2c6   : > { %v1463_v56 = vpop.eup %1462  ;;  %v2011_v29 = vpack.c.bf16 %v1461_v55, %v1457_v60 }
 0x2c7   : > { %1468 = vpow2.f32 %v837_v4  ;;  %v2013_v7 = vpack.c.bf16 %v1463_v56, %v1459_v50  ;;  %v1465_v25 = vpop.eup %1464  ;;  %v749_v50 = vpop.xlane.xlu0 %748 }
 0x2c8   : > { %1470 = vpow2.f32 %v839_v2  ;;  %v1467_v52 = vpop.eup %1466 }
 0x2ca   : > { %v752_v51 = vpop.xlane.xlu1 %751  ;;  %v665_v38 = vpop.xlane.xlu2 %664 }
 0x2cb   : > { %v757_v39 = vsub.f32 %v1753_v45, %v665_v38  ;;  %v758_v6 = vsub.f32 %v1755_v46, %v665_v38  ;;  %v813_v45 = vsub.f32 %v1896_v54, %v749_v50  ;;  %v815_v56 = vsub.f32 %v1939_v12, %v752_v51 }
 0x2cc   : > { %v814_v12 = vsub.f32 %v1898_v53, %v749_v50 }
 0x2cd   : > { %v1469_v61 = vpop.eup %1468  ;;  %v825_v28 = vmul.f32 1.442695, %v757_v39  ;;  %v827_v59 = vmul.f32 1.442695, %v758_v6  ;;  %v941_v6 = vmul.f32 1.442695, %v815_v56 }
 0x2ce   : > { %v1471_v15 = vpop.eup %1470  ;;  %v2015_v24 = vpack.c.bf16 %v1469_v61, %v1465_v25 }
 0x2cf   : > { %v2017_v17 = vpack.c.bf16 %v1471_v15, %v1467_v52  ;;  %1472 = vpow2.f32 %v825_v28  ;;  %v937_v15 = vmul.f32 1.442695, %v813_v45 }
 0x2d0   : > { %994 = vmatpush.bf16.xpose.msra.mxu2 %v2015_v24  ;;  %1474 = vpow2.f32 %v827_v59  ;;  %v939_v59 = vmul.f32 1.442695, %v814_v12  ;;  %v1346_v12 = vld [vmem:[%s356_s0 + $0x4] sm:$0xf] }
 0x2d1   : > { %1008 = vmatpush.bf16.xpose.msra.mxu3 %v2017_v17 }
 0x2d2   : > { %v2020_v5 = vpop.xlane.xlu1 %733  ;;  %v2025_v19 = vpop.xlane.xlu2 %724 }
 0x2d5   : > { %v1473_v55 = vpop.eup %1472 }
 0x2d6   : > { %v1475_v25 = vpop.eup %1474 }
 0x2da   : > { %v668_v63 = vpop.xlane.xlu1 %667  ;;  %v659_v46 = vpop.xlane.xlu2 %658 }
 0x2db   : > { %v759_v62 = vsub.f32 %v1759_v47, %v668_v63  ;;  %v760_v49 = vsub.f32 %v1761_v48, %v668_v63  ;;  %v816_v47 = vsub.f32 %v1941_v57, %v752_v51  ;;  %v753_v52 = vsub.f32 %v1743_v41, %v659_v46 }
 0x2dc   : > { %v754_v38 = vsub.f32 %v1745_v42, %v659_v46 }
 0x2dd   : > { %v829_v60 = vmul.f32 1.442695, %v759_v62  ;;  %v831_v4 = vmul.f32 1.442695, %v760_v49  ;;  %v943_v54 = vmul.f32 1.442695, %v816_v47 }
 0x2de   : > { %v817_v62 = vmul.f32 1.442695, %v753_v52  ;;  %v819_v42 = vmul.f32 1.442695, %v754_v38  ;;  %v804_v52 = vsub.f32 %v1865_v37, %v2020_v5 }
 0x2df   : > { %1476 = vpow2.f32 %v829_v60 }
 0x2e0   : > { %1478 = vpow2.f32 %v831_v4 }
 0x2e1   : > { %1480 = vpow2.f32 %v937_v15  ;;  %v802_v15 = vsub.f32 %v1861_v35, %v2009_v0  ;;  %v797_v35 = vsub.f32 %v1851_v30, %v2025_v19 }
 0x2e2   : > { %v2029_v2 = vpop.xlane.xlu1 %727  ;;  %1482 = vpow2.f32 %v941_v6  ;;  %v919_v6 = vmul.f32 1.442695, %v804_v52 }
 0x2e3   : > { %1484 = vpow2.f32 %v943_v54 }
 0x2e4   : > { %1486 = vpow2.f32 %v817_v62 }
 0x2e5   : > { %v1477_v48 = vpop.eup %1476  ;;  %1488 = vpow2.f32 %v819_v42 }
 0x2e6   : > { %v1479_v61 = vpop.eup %1478  ;;  %v2036_v39 = vpack.c.bf16 %v1477_v48, %v1473_v55  ;;  %v803_v48 = vsub.f32 %v1863_v36, %v2020_v5  ;;  %v799_v36 = vsub.f32 %v1855_v32, %v2029_v2  ;;  %v719_v5 = vpop.xlane.xlu2 %718 }
 0x2e7   : > { %v2038_v63 = vpack.c.bf16 %v1479_v61, %v1475_v25  ;;  %v1481_v60 = vpop.eup %1480  ;;  %v801_v61 = vsub.f32 %v1859_v34, %v2009_v0  ;;  %v800_v34 = vsub.f32 %v1857_v33, %v2029_v2  ;;  %v798_v0 = vsub.f32 %v1853_v31, %v2025_v19  ;;  %v1329_v33 = vld [vmem:[%s356_s0] sm:$0xf]  ;;  %v1347_v2 = vld [vmem:[%s356_s0 + $0x4] sm:$0xf0] }
 0x2e8   : > { %995 = vmatpush.bf16.xpose.msra.mxu2 %v2036_v39  ;;  %v1483_v53 = vpop.eup %1482  ;;  %v917_v38 = vmul.f32 1.442695, %v803_v48  ;;  %v909_v32 = vmul.f32 1.442695, %v799_v36 }
 0x2e9   : > { %1009 = vmatpush.bf16.xpose.msra.mxu3 %v2038_v63  ;;  %v1485_v4 = vpop.eup %1484  ;;  %v2049_v25 = vpack.c.bf16 %v1483_v53, %v1481_v60  ;;  %v913_v54 = vmul.f32 1.442695, %v801_v61  ;;  %v911_v62 = vmul.f32 1.442695, %v800_v34 }
 0x2ea   : > { %v662_v28 = vpop.xlane.xlu1 %661  ;;  %v1487_v50 = vpop.eup %1486 }
 0x2eb   : > { %v755_v41 = vsub.f32 %v2245_v8, %v662_v28  ;;  %v756_v57 = vsub.f32 %v1751_v44, %v662_v28  ;;  %v1489_v45 = vpop.eup %1488  ;;  %v915_v28 = vmul.f32 1.442695, %v802_v15 }
 0x2ed   : > { %v821_v51 = vmul.f32 1.442695, %v755_v41  ;;  %v823_v49 = vmul.f32 1.442695, %v756_v57  ;;  %v2081_v41 = vor.u32 %v1347_v2, %v1329_v33  ;;  %v1331_v57 = vld [vmem:[%s356_s0 + $0x8] sm:$0xf0] }
 0x2ee   : > { %v2083_v30 = vor.u32 %v1346_v12, %v1331_v57  ;;  %s1143_s0 = sshll.u32 %s326_s12, 4  ;;  %s1144_s0 = int_to_ptr.vmem [resolvable:$true] %s1143_s0 }
 0x2ef   : > { %1490 = vpow2.f32 %v821_v51  ;;  %v905_v51 = vmul.f32 1.442695, %v797_v35 }
 0x2f0   : > { %1492 = vpow2.f32 %v823_v49 }
 0x2f1   : > { %1494 = vpow2.f32 %v939_v59  ;;  %v907_v59 = vmul.f32 1.442695, %v798_v0 }
 0x2f2   : > { %1496 = vpow2.f32 %v917_v38  ;;  %v722_v37 = vpop.xlane.xlu1 %721 }
 0x2f3   : > { %1498 = vpow2.f32 %v919_v6  ;;  %v795_v19 = vsub.f32 %v2249_v9, %v722_v37  ;;  %v796_v53 = vsub.f32 %v2248_v43, %v722_v37 }
 0x2f4   : > { %1500 = vpow2.f32 %v913_v54 }
 0x2f5   : > { %v1491_v8 = vpop.eup %1490  ;;  %1502 = vpow2.f32 %v915_v28  ;;  %v901_v9 = vmul.f32 1.442695, %v795_v19  ;;  %v903_v48 = vmul.f32 1.442695, %v796_v53 }
 0x2f6   : > { %v1493_v46 = vpop.eup %1492  ;;  %v2045_v44 = vpack.c.bf16 %v1491_v8, %v1487_v50  ;;  %1504 = vpow2.f32 %v909_v32  ;;  %v793_v50 = vsub.f32 %v1843_v26, %v719_v5  ;;  %v794_v8 = vsub.f32 %v1845_v27, %v719_v5 }
 0x2f7   : > { %v1495_v55 = vpop.eup %1494  ;;  %v2047_v56 = vpack.c.bf16 %v1493_v46, %v1489_v45  ;;  %1506 = vpow2.f32 %v911_v62 }
 0x2f8   : > { %996 = vmatpush.bf16.xpose.msra.mxu2 %v2045_v44  ;;  %v2052_v47 = vpack.c.bf16 %v1485_v4, %v1495_v55  ;;  %v1497_v42 = vpop.eup %1496  ;;  %1508 = vpow2.f32 %v905_v51  ;;  %v713_v55 = vpop.xlane.xlu2 %712  ;;  %v897_v43 = vmul.f32 1.442695, %v793_v50  ;;  %v899_v15 = vmul.f32 1.442695, %v794_v8 }
 0x2f9   : > { %1010 = vmatpush.bf16.xpose.msra.mxu3 %v2047_v56  ;;  %v1499_v49 = vpop.eup %1498  ;;  %1510 = vpow2.f32 %v907_v59  ;;  %v789_v28 = vsub.f32 %v1835_v22, %v713_v55  ;;  %v790_v34 = vsub.f32 %v1837_v23, %v713_v55 }
 0x2fa   : > { %v1501_v31 = vpop.eup %1500  ;;  %v716_v46 = vpop.xlane.xlu1 %715  ;;  %1512 = vpow2.f32 %v901_v9 }
 0x2fb   : > { %v1503_v60 = vpop.eup %1502  ;;  %v2089_v4 = vpack.c.bf16 %v1497_v42, %v1501_v31  ;;  %v791_v26 = vsub.f32 %v2251_v16, %v716_v46  ;;  %1514 = vpow2.f32 %v903_v48  ;;  %v792_v27 = vsub.f32 %v2250_v58, %v716_v46 }
 0x2fc   : > { %v2092_v45 = vpack.c.bf16 %v1499_v49, %v1503_v60  ;;  %v1505_v52 = vpop.eup %1504  ;;  %1516 = vpow2.f32 %v897_v43  ;;  %v889_v5 = vmul.f32 1.442695, %v789_v28  ;;  %v891_v32 = vmul.f32 1.442695, %v790_v34  ;;  %v2259_v43 = vld [vmem:[#allocation20_spill] sm:$0xff]  ;;  %v1118_v34 = vld [vmem:[%s335_s17 + $0x10] sm:$0xff] }
 0x2fd   : > { %v1507_v61 = vpop.eup %1506  ;;  %1518 = vpow2.f32 %v899_v15  ;;  %v893_v37 = vmul.f32 1.442695, %v791_v26  ;;  %v895_v16 = vmul.f32 1.442695, %v792_v27  ;;  %v2261_v15 = vld [vmem:[#allocation22_spill] sm:$0xff]  ;;  %v2263_v26 = vld [vmem:[#allocation24_spill] sm:$0xff] }
 0x2fe   : > { %v1509_v38 = vpop.eup %1508 }
 0x2ff   : > { %997 = vmatmul.bf16.vlgmr.msra.gmra.mxu2 %v2081_v41  ;;  %v1511_v6 = vpop.eup %1510  ;;  %v2099_v54 = vpack.c.bf16 %v1505_v52, %v1509_v38  ;;  %1520 = vpow2.f32 %v893_v37  ;;  %v2258_v52 = vld [vmem:[#allocation19_spill] sm:$0xff] }
 0x300   : > { %1017 = vmatpush.bf16.xpose.msrb.mxu2 %v2049_v25  ;;  %1011 = vmatmul.bf16.vlgmr.msra.gmra.mxu3 %v2083_v30  ;;  %v2102_v36 = vpack.c.bf16 %v1507_v61, %v1511_v6  ;;  %v1513_v0 = vpop.eup %1512  ;;  %v707_v33 = vpop.xlane.xlu2 %706  ;;  %1522 = vpow2.f32 %v895_v16  ;;  %v2260_v61 = vld [vmem:[#allocation21_spill] sm:$0xff]  ;;  %v2262_v38 = vld [vmem:[#allocation23_spill] sm:$0xff] }
 0x301   : > { %1031 = vmatpush.bf16.xpose.msrb.mxu3 %v2052_v47  ;;  %v1515_v58 = vpop.eup %1514  ;;  %1524 = vpow2.f32 %v889_v5  ;;  %v785_v57 = vsub.f32 %v2247_v3, %v707_v33  ;;  %v786_v51 = vsub.f32 %v2246_v11, %v707_v33 }
 0x302   : > { %v710_v35 = vpop.xlane.xlu1 %709  ;;  %v1517_v2 = vpop.eup %1516  ;;  %1526 = vpow2.f32 %v891_v32 }
 0x303   : > { %v787_v22 = vsub.f32 %v2253_v14, %v710_v35  ;;  %v1519_v12 = vpop.eup %1518  ;;  %v788_v23 = vsub.f32 %v2252_v20, %v710_v35  ;;  %v2109_v62 = vpack.c.bf16 %v1513_v0, %v1517_v2  ;;  %v881_v31 = vmul.f32 1.442695, %v785_v57  ;;  %v1119_v57 = vld [vmem:[%s335_s17 + $0x18] sm:$0xff] }
 0x304   : > { %v2112_v42 = vpack.c.bf16 %v1515_v58, %v1519_v12  ;;  %v883_v20 = vmul.f32 1.442695, %v786_v51 }
 0x305   : > { %v885_v49 = vmul.f32 1.442695, %v787_v22  ;;  %v887_v14 = vmul.f32 1.442695, %v788_v23  ;;  %v1521_v59 = vpop.eup %1520 }
 0x306   : > { %v1523_v19 = vpop.eup %1522 }
 0x307   : > { %v1525_v60 = vpop.eup %1524  ;;  %1528 = vpow2.f32 %v885_v49 }
 0x308   : > { %1018 = vmatpush.bf16.xpose.msrb.mxu2 %v1993_v18  ;;  %v1527_v53 = vpop.eup %1526  ;;  %1530 = vpow2.f32 %v887_v14  ;;  %v963_v3 = vpack.c.bf16 %v1521_v59, %v1525_v60 }
 0x309   : > { %1032 = vmatpush.bf16.xpose.msrb.mxu3 %v1995_v1  ;;  %1532 = vpow2.f32 %v881_v31  ;;  %v964_v50 = vpack.c.bf16 %v1523_v19, %v1527_v53 }
 0x30a   : > { %1534 = vpow2.f32 %v883_v20 }
 0x30d   : > { %v1529_v11 = vpop.eup %1528 }
 0x30e   : > { %v1531_v8 = vpop.eup %1530 }
 0x30f   : > { %v1533_v46 = vpop.eup %1532 }
 0x310   : > { %1019 = vmatpush.bf16.xpose.msrb.mxu2 %v2011_v29  ;;  %v1535_v9 = vpop.eup %1534  ;;  %v961_v55 = vpack.c.bf16 %v1529_v11, %v1533_v46 }
 0x311   : > { %1033 = vmatpush.bf16.xpose.msrb.mxu3 %v2013_v7  ;;  %v962_v48 = vpack.c.bf16 %v1531_v8, %v1535_v9 }
 0x318   : > { %1020 = vmatpush.bf16.xpose.msrb.mxu2 %v2089_v4 }
 0x319   : > { %1034 = vmatpush.bf16.xpose.msrb.mxu3 %v2092_v45 }
 0x320   : > { %1021 = vmatpush.bf16.xpose.msrb.mxu2 %v2099_v54 }
 0x321   : > { %1035 = vmatpush.bf16.xpose.msrb.mxu3 %v2102_v36 }
 0x328   : > { %1022 = vmatpush.bf16.xpose.msrb.mxu2 %v2109_v62 }
 0x329   : > { %1036 = vmatpush.bf16.xpose.msrb.mxu3 %v2112_v42 }
 0x330   : > { %1023 = vmatpush.bf16.xpose.msrb.mxu2 %v963_v3 }
 0x331   : > { %1037 = vmatpush.bf16.xpose.msrb.mxu3 %v964_v50 }
 0x338   : > { %1024 = vmatpush.bf16.xpose.msrb.mxu2 %v961_v55 }
 0x339   : > { %1038 = vmatpush.bf16.xpose.msrb.mxu3 %v962_v48 }
 0x33f   : > { %1025 = vmatmul.bf16.vlgmr.msrb.gmra.mxu2 %v2081_v41  ;;  %v1107_v41 = vstv %s2150_s9  ;;  %s1556_s9 = scalar_lea.hbm %s1555_s7, 32 }
 0x340   : > { %1052 = vmatpush.bf16.xpose.msra.mxu2 %v1915_v13  ;;  %1039 = vmatmul.bf16.vlgmr.msrb.gmra.mxu3 %v2083_v30  ;;  %v1045_v13 = vld [vmem:[%s2199_s1] sm:$0x3]  ;;  %p1557_p12 = scmp.ne.s32.totalorder %s1555_s7, %s1556_s9  ;;  %p1562_p2 = scmp.lt.s32.totalorder %s1560_s16, %s1556_s9 }
 0x341   : > { %1065 = vmatpush.bf16.xpose.msra.mxu3 %v1919_v10  ;;  %1047 = vst [vmem:[#allocation1] ss:$9 sm:$0xff] %v1045_v13 }
 0x342   : > { %p1558_p13 = pnand %p1557_p12, %p1701_p4  ;;  %p1563_p3 = por %p1562_p2, %p1561_p1 }
 0x344   : > { %p1559_p0 = pneg %p1558_p13 }
 0x346   : > { %p1564_p5 = pnand %p1563_p3, %p1559_p0 }
 0x348   : > { %1053 = vmatpush.bf16.xpose.msra.mxu2 %v2258_v52  ;;  %v1048_v10 = vld [vmem:[#allocation1] sm:$0xff] }
 0x349   : > { %1066 = vmatpush.bf16.xpose.msra.mxu3 %v2259_v43 }
 0x350   : > { %1054 = vmatpush.bf16.xpose.msra.mxu2 %v2260_v61 }
 0x351   : > { %1067 = vmatpush.bf16.xpose.msra.mxu3 %v2261_v15 }
 0x358   : > { %1055 = vmatpush.bf16.xpose.msra.mxu2 %v2262_v38 }
 0x359   : > { %1068 = vmatpush.bf16.xpose.msra.mxu3 %v2263_v26 }
 0x360   : > { %1056 = vmatpush.bf16.xpose.msra.mxu2 %v2001_v21  ;;  %v1049_v21 = vld [vmem:[#allocation1 + $0x9] sm:$0xff] }
 0x361   : > { %1069 = vmatpush.bf16.xpose.msra.mxu3 %v2003_v40 }
 0x368   : > { %1057 = vmatpush.bf16.xpose.msra.mxu2 %v2015_v24 }
 0x369   : > { %1070 = vmatpush.bf16.xpose.msra.mxu3 %v2017_v17 }
 0x370   : > { %1058 = vmatpush.bf16.xpose.msra.mxu2 %v2036_v39 }
 0x371   : > { %1071 = vmatpush.bf16.xpose.msra.mxu3 %v2038_v63 }
 0x378   : > { %1059 = vmatpush.bf16.xpose.msra.mxu2 %v2045_v44 }
 0x379   : > { %1072 = vmatpush.bf16.xpose.msra.mxu3 %v2047_v56 }
 0x37f   : > { %1060 = vmatmul.bf16.vlgmr.msra.gmra.mxu2 %v1048_v10 }
 0x380   : > { %1078 = vmatpush.bf16.xpose.msrb.mxu2 %v2049_v25  ;;  %1073 = vmatmul.bf16.vlgmr.msra.gmra.mxu3 %v1049_v21 }
 0x381   : > { %1091 = vmatpush.bf16.xpose.msrb.mxu3 %v2052_v47 }
 0x388   : > { %1079 = vmatpush.bf16.xpose.msrb.mxu2 %v1993_v18  ;;  %v998_v18 = vpop.f32.mrf.mxu2 }
 0x389   : > { %1092 = vmatpush.bf16.xpose.msrb.mxu3 %v1995_v1  ;;  %v1012_v1 = vpop.f32.mrf.mxu3 }
 0x38a   : > { %v1013_v27 = vadd.f32 %v1012_v1, %v998_v18 }
 0x390   : > { %1080 = vmatpush.bf16.xpose.msrb.mxu2 %v2011_v29  ;;  %v1000_v40 = vpop.f32.mrf.mxu2 }
 0x391   : > { %1093 = vmatpush.bf16.xpose.msrb.mxu3 %v2013_v7  ;;  %v1014_v29 = vpop.f32.mrf.mxu3 }
 0x398   : > { %1081 = vmatpush.bf16.xpose.msrb.mxu2 %v2089_v4 }
 0x399   : > { %1094 = vmatpush.bf16.xpose.msrb.mxu3 %v2092_v45 }
 0x3a0   : > { %1082 = vmatpush.bf16.xpose.msrb.mxu2 %v2099_v54  ;;  %v1015_v54 = vadd.f32 %v1014_v29, %v1000_v40 }
 0x3a1   : > { %1095 = vmatpush.bf16.xpose.msrb.mxu3 %v2102_v36  ;;  %v1116_v36 = vld [vmem:[%s335_s17] sm:$0xff] }
 0x3a8   : > { %1083 = vmatpush.bf16.xpose.msrb.mxu2 %v2109_v62  ;;  %v1117_v62 = vld [vmem:[%s335_s17 + $0x8] sm:$0xff] }
 0x3a9   : > { %1096 = vmatpush.bf16.xpose.msrb.mxu3 %v2112_v42 }
 0x3b0   : > { %1084 = vmatpush.bf16.xpose.msrb.mxu2 %v963_v3 }
 0x3b1   : > { %1097 = vmatpush.bf16.xpose.msrb.mxu3 %v964_v50 }
 0x3b8   : > { %1085 = vmatpush.bf16.xpose.msrb.mxu2 %v961_v55 }
 0x3b9   : > { %1098 = vmatpush.bf16.xpose.msrb.mxu3 %v962_v48 }
 0x3bf   : > { %1086 = vmatmul.bf16.vlgmr.msrb.gmra.mxu2 %v1048_v10 }
 0x3c0   : > { %1099 = vmatmul.bf16.vlgmr.msrb.gmra.mxu3 %v1049_v21 }
 0x3c2   : > { %v1026_v7 = vpop.f32.mrf.mxu2 }
 0x3c3   : > { %v1040_v24 = vpop.f32.mrf.mxu3 }
 0x3c4   : > { %v1041_v17 = vadd.f32 %v1040_v24, %v1026_v7 }
 0x3ca   : > { %v1028_v39 = vpop.f32.mrf.mxu2 }
 0x3cb   : > { %v1042_v63 = vpop.f32.mrf.mxu3 }
 0x3cc   : > { %v1043_v44 = vadd.f32 %v1042_v63, %v1028_v39 }
 0x402   : > { %v1061_v56 = vpop.f32.mrf.mxu2 }
 0x403   : > { %v1074_v25 = vpop.f32.mrf.mxu3 }
 0x404   : > { %v1075_v47 = vadd.f32 %v1074_v25, %v1061_v56 }
 0x406   : > { %1536 = vrcp.f32 %v1075_v47 }
 0x40a   : > { %v1063_v30 = vpop.f32.mrf.mxu2 }
 0x40b   : > { %v1076_v4 = vpop.f32.mrf.mxu3 }
 0x40c   : > { %v1537_v45 = vpop.eup %1536 }
 0x40d   : > { %v1108_v6 = vmul.f32 %v1537_v45, %v1107_v41 }
 0x40f   : > { %v1110_v28 = vperm.slane %v1108_v6, 0 }
 0x411   : > { %v1112_v37 = vmul.f32 %v1110_v28, %v1013_v27  ;;  %v1114_v16 = vmul.f32 %v1110_v28, %v1015_v54 }
 0x413   : > { %v1120_v35 = vadd.f32 %v1116_v36, %v1112_v37  ;;  %v1122_v0 = vadd.f32 %v1118_v34, %v1114_v16 }
 0x415   : > { %1124 = vst [vmem:[%s326_s12] sm:$0xff] %v1120_v35 }
 0x416   : > { %1126 = vst [vmem:[%s326_s12 + $0x10] sm:$0xff] %v1122_v0 }
 0x442   : > { %v1087_v5 = vpop.f32.mrf.mxu2 }
 0x443   : > { %v1100_v58 = vpop.f32.mrf.mxu3 }
 0x444   : > { %v1101_v32 = vadd.f32 %v1100_v58, %v1087_v5 }
 0x446   : > { %1538 = vrcp.f32 %v1101_v32 }
 0x44a   : > { %v1089_v33 = vpop.f32.mrf.mxu2 }
 0x44b   : > { %v1102_v2 = vpop.f32.mrf.mxu3 }
 0x44c   : > { %v1539_v22 = vpop.eup %1538 }
 0x44d   : > { %v1109_v12 = vmul.f32 %v1539_v22, %v1107_v41 }
 0x44f   : > { %v1111_v23 = vperm.slane %v1109_v12, 0 }
 0x451   : > { %v1113_v42 = vmul.f32 %v1111_v23, %v1041_v17  ;;  %v1115_v51 = vmul.f32 %v1111_v23, %v1043_v44 }
 0x453   : > { %v1121_v49 = vadd.f32 %v1117_v62, %v1113_v42  ;;  %v1123_v14 = vadd.f32 %v1119_v57, %v1115_v51 }
 0x455   : > { %1125 = vst [vmem:[%s326_s12 + $0x8] sm:$0xff] %v1121_v49 }
 0x456   : > { %1127 = vst [vmem:[%s326_s12 + $0x18] sm:$0xff] %v1123_v14 }
 0x457   : > { %1567 = shalt.err (!%p1564_p5)
}
 0x458   : > { %s1621_s14 = smov 256   ;;  %s1622_s12 = smov 16  }
 0x459   : > { %1350 = dma.vmem_to_hbm [thread:$0]  (%p1701_p4), %s1144_s0, 512, %s1146_s29, %s1129_s26, %s1621_s14, %s1621_s14, %s1622_s12  }
 0x45a PF: > { %p1356_p6 = scmp.ge.s32.totalorder %s1618_s28, 2  ;;  %s1160_s19 = sand.u32 1, %s1598_s23  }
 0x45b   : > { %s1161_s20 = scalar_lea.sflag [#allocation4], %s1160_s19 }
 0x45c   : > { %p1353_p7 = pnand %p1356_p6, %p1708_p8 }
 0x45e   : > { %p1354_p9 = pneg %p1353_p7 }
 0x460   : > { %1593 = dma.done.wait (%p1354_p9), %s1161_s20, 512  }
 0x461   : > { %1595 = vsyncadd (%p1354_p9), %s1161_s20, 4294966784  ;;  %s20_s28 = sadd.s32 1, %s1618_s28   ;;  %s2264_s23 = smov %s1602_s24 }
 0x462   : > { %p17_p10 = scmp.ge.s32.totalorder %s20_s28, 4   ;;  %s2265_s24 = smov %s1606_s25 }
 0x463   : > { %s2266_s25 = smov %s1714_s11  ;;  %s2267_s26 = smov %s1614_s27 }
 0x464   : > { %s2268_s27 = smov %s2270_s30  ;;  %19 = sbr.rel (!%p17_p10) target bundleno = 6 (0x6), region = 88 }
 0x469   :  { %1167 = vsyncpa [#allocation4], 1 }
 0x46a   :  { %1169 = vsyncpa [#allocation4 + $0x1], 1 }

</bundles_post_ra>
